<compile_context>
chip_gen: v7x
topology: tpu7x:2x2x1
jax: 0.10.0
libtpu: 0.0.40
codegen_flags: <defaults>
</compile_context>

<pallas_src>
import numpy as np
import jax
import jax.numpy as jnp
from jax.experimental import pallas as pl
from jax.experimental.pallas import tpu as pltpu

# ---------------------------------------------------------------------------
# static index tables from the PyTorch Proc module
# ---------------------------------------------------------------------------
JOINT_TO_IGNORE = np.array([0, 1, 6, 11, 16, 20, 23, 24, 28, 31])
INDEX_2212 = [[0], [1, 2, 3], [4], [5, 6, 7], [8, 9], [10, 11],
              [12], [13], [14, 15, 16], [17], [18], [19, 20, 21]]
INDEX_127 = [[0, 1], [2, 3], [4, 5], [6, 7], [7, 8], [9, 10], [10, 11]]
INDEX_74 = [[0, 2], [1, 2], [3, 4], [5, 6]]

N_JOINTS_FULL = 32
SCALE_J = (22, 12, 7, 4)
J_TOTAL = sum(SCALE_J)          # 45


def _used_joints():
    return np.setdiff1d(np.arange(N_JOINTS_FULL), JOINT_TO_IGNORE)   # 22 joints


def _dim_used():
    dims_ignore = np.concatenate(
        (JOINT_TO_IGNORE * 3, JOINT_TO_IGNORE * 3 + 1, JOINT_TO_IGNORE * 3 + 2))
    return np.setdiff1d(np.arange(96), dims_ignore)


def _group_matrix(index, j_in):
    """(J_in, J_out) averaging matrix: column i averages joints of group i."""
    m = np.zeros((j_in, len(index)), dtype=np.float32)
    for i, grp in enumerate(index):
        for j in grp:
            m[j, i] = 1.0 / len(grp)
    return m


def _build_dall():
    """(32, 45): fused joint-selection + multi-scale averaging matrix."""
    s22 = np.zeros((N_JOINTS_FULL, 22), dtype=np.float32)
    for col, joint in enumerate(_used_joints()):
        s22[joint, col] = 1.0
    d22 = s22
    d12 = d22 @ _group_matrix(INDEX_2212, 22)
    d7 = d12 @ _group_matrix(INDEX_127, 12)
    d4 = d7 @ _group_matrix(INDEX_74, 7)
    return np.concatenate([d22, d12, d7, d4], axis=1)   # (32, 45)


def _build_weights(bt):
    """(1, 45) per-lane weights: 1/(B*T*J_s) for each scale block."""
    parts = [np.full(j, 1.0 / (bt * j), dtype=np.float32) for j in SCALE_J]
    return np.concatenate(parts)[None, :]


# ---------------------------------------------------------------------------
# Pallas kernel: one matmul + one fused diff/norm/weighted-reduce pass.
# ---------------------------------------------------------------------------
def _msrgcn_loss_kernel(g_ref, p_ref, d_ref, w_ref, out_ref):
    # g_ref: (3*B*T, 32)   ground truth, rows ordered (coord, batch, time)
    # p_ref: (3*B*T, 45)   predictions p22|p12|p7|p4 along lanes, same row order
    # d_ref: (32, 45)      fused selection + multi-scale averaging matrix
    # w_ref: (1, 45)       per-lane weights 1/(B*T*J_s)
    g_all = jnp.dot(g_ref[...], d_ref[...],
                    preferred_element_type=jnp.float32)        # (3*B*T, 45)
    diff = g_all - p_ref[...]
    sq = diff * diff
    bt = sq.shape[0] // 3
    # Sum over the 3 coordinates: three aligned static row slices (pure VPU adds).
    ssq = sq[0:bt] + sq[bt:2 * bt] + sq[2 * bt:3 * bt]          # (B*T, 45)
    dist = jnp.sqrt(ssq)
    out_ref[0, 0] = jnp.sum(dist * w_ref[...])


# ---------------------------------------------------------------------------
# wrapper
# ---------------------------------------------------------------------------
def _pred_rows(p):
    """(B, 3*J, T) -> (3*B*T, J) with rows ordered (coord, batch, time)."""
    b, f, t = p.shape
    j = f // 3
    return (jnp.transpose(p.reshape(b, j, 3, t), (2, 0, 3, 1))
            .reshape(3 * b * t, j).astype(jnp.float32))


def msr_gcn_loss(model_outputs, input_data):
    gt = jnp.concatenate([input_data['observed_pose'],
                          input_data['future_pose']], axis=1)
    b, t = gt.shape[0], gt.shape[1]
    gt = gt.reshape(b, t, N_JOINTS_FULL, 3)                     # (B, T, 32, 3)
    g_rows = (jnp.transpose(gt, (3, 0, 1, 2))
              .reshape(3 * b * t, N_JOINTS_FULL).astype(jnp.float32))

    p_all = jnp.concatenate(
        [_pred_rows(model_outputs[k]) for k in ('p22', 'p12', 'p7', 'p4')],
        axis=1)                                                 # (3*B*T, 45)

    d_all = jnp.asarray(_build_dall())                          # (32, 45)
    w = jnp.asarray(_build_weights(b * t))                      # (1, 45)

    rows = 3 * b * t
    cost = pl.CostEstimate(
        flops=2 * rows * N_JOINTS_FULL * J_TOTAL + 4 * rows * J_TOTAL,
        transcendentals=b * t * J_TOTAL,
        bytes_accessed=4 * (rows * N_JOINTS_FULL + rows * J_TOTAL
                            + N_JOINTS_FULL * J_TOTAL + J_TOTAL + 1))

    vmem = pl.BlockSpec(memory_space=pltpu.MemorySpace.VMEM)
    loss = pl.pallas_call(
        _msrgcn_loss_kernel,
        out_shape=jax.ShapeDtypeStruct((1, 1), jnp.float32),
        in_specs=[vmem, vmem, vmem, vmem],
        out_specs=pl.BlockSpec(memory_space=pltpu.MemorySpace.SMEM),
        cost_estimate=cost,
    )(g_rows, p_all, d_all, w)
    # TODO(synk): forward-only — wrap in jax.custom_vjp for training gradients
    #             (pl.pallas_call has no automatic VJP).
    # TODO(synk): for large B*T on v7x, tile the row axis with a ("parallel",)
    #             grid emitting per-block partial sums finished in the wrapper.
    return {'loss': loss[0, 0]}


# ---------------------------------------------------------------------------
# pure-JAX reference (mirrors the PyTorch code) for a correctness check
# ---------------------------------------------------------------------------
def _ref_loss(model_outputs, input_data):
    gt = jnp.concatenate([input_data['observed_pose'],
                          input_data['future_pose']], axis=1)
    B, T = gt.shape[0], gt.shape[1]
    gt = gt.reshape(B, T, -1)
    x32 = jnp.transpose(gt, (0, 2, 1))
    x22 = x32[:, _dim_used(), :]

    def down(x, index):
        Bx, Fx, Tx = x.shape
        d = x.reshape(Bx, Fx // 3, 3, Tx)
        parts = [jnp.mean(d[:, idx, :, :], axis=1) for idx in index]
        return jnp.stack(parts, axis=1).reshape(Bx, -1, Tx)

    x12 = down(x22, INDEX_2212)
    x7 = down(x12, INDEX_127)
    x4 = down(x7, INDEX_74)
    gts = {'p22': x22, 'p12': x12, 'p7': x7, 'p4': x4}

    def l2(g, o):
        Bx, Fx, Tx = g.shape
        g = jnp.transpose(g.reshape(Bx, -1, 3, Tx), (0, 3, 1, 2))
        o = jnp.transpose(o.reshape(Bx, -1, 3, Tx), (0, 3, 1, 2))
        return jnp.mean(jnp.sqrt(jnp.sum((g - o) ** 2, axis=-1)))

    return sum(l2(gts[k], model_outputs[k]) for k in ('p22', 'p12', 'p7', 'p4'))


if __name__ == "__main__":
    key = jax.random.PRNGKey(0)
    B, T_OBS, T_FUT = 2, 8, 8
    T = T_OBS + T_FUT

    k1, k2, k3, k4, k5, k6 = jax.random.split(key, 6)
    input_data = {
        'observed_pose': jax.random.normal(k1, (B, T_OBS, 32, 3), jnp.float32),
        'future_pose': jax.random.normal(k2, (B, T_FUT, 32, 3), jnp.float32),
    }
    model_outputs = {
        'p22': jax.random.normal(k3, (B, 66, T), jnp.float32),
        'p12': jax.random.normal(k4, (B, 36, T), jnp.float32),
        'p7': jax.random.normal(k5, (B, 21, T), jnp.float32),
        'p4': jax.random.normal(k6, (B, 12, T), jnp.float32),
    }

    out = msr_gcn_loss(model_outputs, input_data)
    loss = jax.block_until_ready(out['loss'])

    ref = jax.block_until_ready(_ref_loss(model_outputs, input_data))
    assert np.isfinite(float(loss))
    np.testing.assert_allclose(np.asarray(loss), np.asarray(ref),
                               rtol=1e-4, atol=1e-4)
    print("KERNEL_OK")
</pallas_src>

<mosaic_0001>
module attributes {stable_mosaic.version = 11 : i64} {
  func.func @_msrgcn_loss_kernel(%arg0: memref<96x32xf32, #tpu.memory_space<vmem>>, %arg1: memref<96x45xf32, #tpu.memory_space<vmem>>, %arg2: memref<32x45xf32, #tpu.memory_space<vmem>>, %arg3: memref<1x45xf32, #tpu.memory_space<vmem>>, %arg4: memref<1x1xf32, #tpu.memory_space<smem>>) attributes {dimension_semantics = [], scalar_prefetch = 0 : i64, scratch_operands = 0 : i64, tpu.core_type = #tpu.core_type<tc>} {
    %c0 = arith.constant 0 : index
    %c0_0 = arith.constant 0 : index
    %0 = vector.load %arg0[%c0, %c0_0] : memref<96x32xf32, #tpu.memory_space<vmem>>, vector<96x32xf32>
    %c0_1 = arith.constant 0 : index
    %c0_2 = arith.constant 0 : index
    %1 = vector.load %arg2[%c0_1, %c0_2] : memref<32x45xf32, #tpu.memory_space<vmem>>, vector<32x45xf32>
    %cst = arith.constant dense<0.000000e+00> : vector<96x45xf32>
    %2 = tpu.matmul %0, %1, %cst {dimension_numbers = #tpu.dot_dimension_numbers<[1], [0], [0], [1], [0, 0, 1, 1], [], []>} : vector<96x32xf32>, vector<32x45xf32>, vector<96x45xf32> -> vector<96x45xf32>
    %c0_3 = arith.constant 0 : index
    %c0_4 = arith.constant 0 : index
    %3 = vector.load %arg1[%c0_3, %c0_4] : memref<96x45xf32, #tpu.memory_space<vmem>>, vector<96x45xf32>
    %4 = arith.subf %2, %3 : vector<96x45xf32>
    %5 = arith.mulf %4, %4 : vector<96x45xf32>
    %6 = vector.extract_strided_slice %5 {offsets = [0, 0], sizes = [32, 45], strides = [1, 1]} : vector<96x45xf32> to vector<32x45xf32>
    %7 = vector.extract_strided_slice %5 {offsets = [32, 0], sizes = [32, 45], strides = [1, 1]} : vector<96x45xf32> to vector<32x45xf32>
    %8 = arith.addf %6, %7 : vector<32x45xf32>
    %9 = vector.extract_strided_slice %5 {offsets = [64, 0], sizes = [32, 45], strides = [1, 1]} : vector<96x45xf32> to vector<32x45xf32>
    %10 = arith.addf %8, %9 : vector<32x45xf32>
    %11 = math.sqrt %10 : vector<32x45xf32>
    %c0_5 = arith.constant 0 : index
    %c0_6 = arith.constant 0 : index
    %12 = vector.load %arg3[%c0_5, %c0_6] : memref<1x45xf32, #tpu.memory_space<vmem>>, vector<1x45xf32>
    %13 = vector.broadcast %12 : vector<1x45xf32> to vector<32x45xf32>
    %14 = arith.mulf %11, %13 : vector<32x45xf32>
    %15 = vector.shape_cast %14 : vector<32x45xf32> to vector<1x32x45xf32>
    %cst_7 = arith.constant dense<0.000000e+00> : vector<1xf32>
    %16 = vector.multi_reduction <add>, %15, %cst_7 [1, 2] : vector<1x32x45xf32> to vector<1xf32>
    %17 = vector.shape_cast %16 : vector<1xf32> to vector<1x1x1xf32>
    %18 = vector.extract %17[0, 0, 0] : f32 from vector<1x1x1xf32>
    %c0_8 = arith.constant 0 : index
    %c0_9 = arith.constant 0 : index
    %19 = memref.load %arg4[%c0_8, %c0_9] : memref<1x1xf32, #tpu.memory_space<smem>>
    memref.store %18, %arg4[%c0_8, %c0_9] : memref<1x1xf32, #tpu.memory_space<smem>>
    return
  }
}

</mosaic_0001>

<bundles_post_ra>
// kernel: tpu_custom_call.1
= control target key start
LH: loop header
LB: loop body
LE: loop exit
PB: predicated region body
PF: predicated region fallthrough
CT: control target
= control target key end

     0   :  { %vm34_vm0 = vcmask 261120   ;;  %s538_s0 = inlined_call_operand.vmem [shape: f32[96,32], index: 0, kind: input, shape index: {}]   ;;  %s539_s1 = inlined_call_operand.vmem [shape: f32[96,45], index: 1, kind: input, shape index: {}]   ;;  %s540_s2 = inlined_call_operand.vmem [shape: f32[32,45], index: 2, kind: input, shape index: {}]   ;;  %s541_s3 = inlined_call_operand.vmem [shape: f32[1,45], index: 3, kind: input, shape index: {}]   ;;  %s542_s4 = inlined_call_operand.hbm [shape: f32[1,1], index: 4, kind: output, shape index: {}]  }
   0x1   :  { %v30_v0 = vld [vmem:[%s540_s2] sm:$0xff]  ;;  %v31_v1 = vld [vmem:[%s540_s2 + $0x8] sm:$0xff]  ;;  %v32_v2 = vld [vmem:[%s540_s2 + $0x10] sm:$0xff] }
   0x2   :  { %v366_v3 = vpack.c.bf16 %v31_v1, %v30_v0  ;;  %v33_v4 = vld [vmem:[%s540_s2 + $0x18] sm:$0xff]  ;;  %v18_v5 = vld [vmem:[%s538_s0] sm:$0xff]  ;;  %v24_v6 = vld [vmem:[%s538_s0 + $0x30] sm:$0xff] }
   0x3   :  { %v370_v7 = vpack.c.bf16 %v33_v4, %v32_v2  ;;  %348 = vmatprep.mubr.msk.f32.mxu0 %vm34_vm0, %v18_v5  ;;  %357 = vmatprep.mubr.msk.f32.mxu1 %vm34_vm0, %v24_v6 }
   0x4   :  { %367 = vmatprep.subr.bf16.mxu0 %v366_v3  ;;  %374 = vmatprep.subr.bf16.mxu1 %v366_v3 }
   0x5   :  { %369 = vmatpush3.bf16.msra.mxu0 %v366_v3  ;;  %376 = vmatpush3.bf16.msra.mxu1 %v366_v3 }
   0x6   :  { %371 = vmatprep.subr.bf16.mxu0 %v370_v7  ;;  %375 = vmatprep.subr.bf16.mxu1 %v370_v7 }
   0x7   :  { %9 = vsyncpa [#allocation3], 0  ;;  %v19_v8 = vld [vmem:[%s538_s0 + $0x8] sm:$0xff]  ;;  %v25_v9 = vld [vmem:[%s538_s0 + $0x38] sm:$0xff]  ;;  %vm279_vm9 = vcmask 367616   ;;  %s389_s19 = scalar_lea.hbm %s542_s4, 16 }
   0x8   :  { %v20_v10 = vld [vmem:[%s538_s0 + $0x10] sm:$0xff]  ;;  %v26_v11 = vld [vmem:[%s538_s0 + $0x40] sm:$0xff]  ;;  %v21_v12 = vld [vmem:[%s538_s0 + $0x18] sm:$0xff]  ;;  %p390_p0 = scmp.ne.s32.totalorder %s542_s4, %s389_s19  ;;  %p393_p1 = scmp.lt.u32.totalorder %s389_s19, %s542_s4 }
   0x9   :  { %373 = vmatpush3.bf16.msra.mxu0 %v370_v7  ;;  %377 = vmatpush3.bf16.msra.mxu1 %v370_v7  ;;  %v27_v13 = vld [vmem:[%s538_s0 + $0x48] sm:$0xff]  ;;  %v22_v14 = vld [vmem:[%s538_s0 + $0x20] sm:$0xff]  ;;  %v28_v15 = vld [vmem:[%s538_s0 + $0x50] sm:$0xff] }
   0xa   :  { %v23_v16 = vld [vmem:[%s538_s0 + $0x28] sm:$0xff]  ;;  %v29_v17 = vld [vmem:[%s538_s0 + $0x58] sm:$0xff]  ;;  %v202_v19 = vld [vmem:[%s539_s1 + $0x30] sm:$0xff]  ;;  %p395_p2 = pnand %p393_p1, %p390_p0 }
   0xb   :  { %v203_v18 = vld [vmem:[%s539_s1 + $0x38] sm:$0xff]  ;;  %v198_v27 = vld [vmem:[%s539_s1 + $0x10] sm:$0xff]  ;;  %v197_v28 = vld [vmem:[%s539_s1 + $0x8] sm:$0xff] }
   0xc   :  { %349 = vmatmul.mubr.msk.f32.vlgmr.msra.gmra.mrb[0].mxu0 %vm34_vm0, %v19_v8  ;;  %358 = vmatmul.mubr.msk.f32.vlgmr.msra.gmra.mrb[0].mxu1 %vm34_vm0, %v25_v9  ;;  %v199_v25 = vld [vmem:[%s539_s1 + $0x18] sm:$0xff]  ;;  %v196_v31 = vld [vmem:[%s539_s1] sm:$0xff]  ;;  %v205_v38 = vld [vmem:[%s539_s1 + $0x48] sm:$0xff] }
   0xd   :  { %351 = vmatprep.mubr.msk.f32.mxu0 %vm34_vm0, %v20_v10  ;;  %360 = vmatprep.mubr.msk.f32.mxu1 %vm34_vm0, %v26_v11  ;;  %v201_v39 = vld [vmem:[%s539_s1 + $0x28] sm:$0xff]  ;;  %v207_v40 = vld [vmem:[%s539_s1 + $0x58] sm:$0xff]  ;;  %v204_v43 = vld [vmem:[%s539_s1 + $0x40] sm:$0xff] }
   0xe   :  { %v200_v44 = vld [vmem:[%s539_s1 + $0x20] sm:$0xff]  ;;  %v206_v45 = vld [vmem:[%s539_s1 + $0x50] sm:$0xff] }
  0x10   :  { %352 = vmatmul.mubr.msk.f32.gmra.mrb[2].mxu0 %vm34_vm0, %v21_v12  ;;  %361 = vmatmul.mubr.msk.f32.gmra.mrb[2].mxu1 %vm34_vm0, %v27_v13 }
  0x11   :  { %354 = vmatprep.mubr.msk.f32.mxu0 %vm34_vm0, %v22_v14  ;;  %363 = vmatprep.mubr.msk.f32.mxu1 %vm34_vm0, %v28_v15 }
  0x14   :  { %355 = vmatmul.mubr.msk.f32.gmra.mrb[4].mxu0 %vm34_vm0, %v23_v16  ;;  %364 = vmatmul.mubr.msk.f32.gmra.mrb[4].mxu1 %vm34_vm0, %v29_v17 }
  0xdf   :  { %v350_v20 = vpop.f32.mrb[0].mxu0  ;;  %v359_v21 = vpop.f32.mrb[0].mxu1 }
  0xe0   :  { %v137_v22 = vpop.f32.mrb[1].mxu0  ;;  %v215_v23 = vsub.f32 %v359_v21, %v203_v18  ;;  %v167_v24 = vpop.f32.mrb[1].mxu1  ;;  %v209_v41 = vsub.f32 %v350_v20, %v197_v28 }
  0xe1   :  { %v214_v26 = vsub.f32 %v167_v24, %v202_v19  ;;  %v208_v46 = vsub.f32 %v137_v22, %v196_v31 }
  0xe2   :  { %v227_v32 = vmul.f32 %v215_v23, %v215_v23  ;;  %v221_v60 = vmul.f32 %v209_v41, %v209_v41 }
  0xe3   :  { %v353_v29 = vpop.f32.mrb[2].mxu0  ;;  %v362_v30 = vpop.f32.mrb[2].mxu1  ;;  %v226_v36 = vmul.f32 %v214_v26, %v214_v26  ;;  %v220_v63 = vmul.f32 %v208_v46, %v208_v46  ;;  %v323_v26 = vld [vmem:[%s541_s3] ss:$0 sm:$0xff] }
  0xe4   :  { %v211_v33 = vsub.f32 %v353_v29, %v199_v25  ;;  %v147_v34 = vpop.f32.mrb[3].mxu0  ;;  %v177_v35 = vpop.f32.mrb[3].mxu1  ;;  %v217_v51 = vsub.f32 %v362_v30, %v205_v38 }
  0xe5   :  { %v210_v37 = vsub.f32 %v147_v34, %v198_v27  ;;  %v216_v57 = vsub.f32 %v177_v35, %v204_v43 }
  0xe6   :  { %v223_v42 = vmul.f32 %v211_v33, %v211_v33  ;;  %v229_v2 = vmul.f32 %v217_v51, %v217_v51 }
  0xe7   :  { %v222_v47 = vmul.f32 %v210_v37, %v210_v37  ;;  %v356_v48 = vpop.f32.mrb[4].mxu0  ;;  %v365_v49 = vpop.f32.mrb[4].mxu1  ;;  %v228_v5 = vmul.f32 %v216_v57, %v216_v57 }
  0xe8   :  { %v235_v50 = vadd.f32 %v227_v32, %v223_v42  ;;  %v213_v52 = vsub.f32 %v356_v48, %v201_v39  ;;  %v219_v53 = vsub.f32 %v365_v49, %v207_v40  ;;  %v157_v54 = vpop.f32.mrb[5].mxu0  ;;  %v187_v55 = vpop.f32.mrb[5].mxu1 }
  0xe9   :  { %v234_v56 = vadd.f32 %v226_v36, %v222_v47  ;;  %v212_v58 = vsub.f32 %v157_v54, %v200_v44  ;;  %v218_v59 = vsub.f32 %v187_v55, %v206_v45 }
  0xea   :  { %v225_v61 = vmul.f32 %v213_v52, %v213_v52  ;;  %v231_v62 = vmul.f32 %v219_v53, %v219_v53 }
  0xeb   :  { %v224_v0 = vmul.f32 %v212_v58, %v212_v58  ;;  %v230_v1 = vmul.f32 %v218_v59, %v218_v59 }
  0xec   :  { %v233_v3 = vadd.f32 %v225_v61, %v221_v60  ;;  %v239_v4 = vadd.f32 %v235_v50, %v231_v62 }
  0xed   :  { %v232_v6 = vadd.f32 %v224_v0, %v220_v63  ;;  %v238_v7 = vadd.f32 %v234_v56, %v230_v1 }
  0xee   :  { %v237_v8 = vadd.f32 %v233_v3, %v229_v2  ;;  %381 = vrsqrt.f32 %v239_v4  ;;  %vm263_vm1 = vcmp.eq.f32.partialorder %v239_v4, inf  ;;  %v266_v25 = vand.u32 2147483648, %v239_v4 }
  0xef   :  { %v236_v9 = vadd.f32 %v232_v6, %v228_v5  ;;  %383 = vrsqrt.f32 %v238_v7  ;;  %vm256_vm3 = vcmp.eq.f32.partialorder %v238_v7, inf  ;;  %vm258_vm4 = vcmp.eq.f32.partialorder %v238_v7, 0.0 }
  0xf0   :  { %385 = vrsqrt.f32 %v237_v8  ;;  %vm249_vm2 = vcmp.eq.f32.partialorder %v237_v8, inf  ;;  %vm251_vm5 = vcmp.eq.f32.partialorder %v237_v8, 0.0  ;;  %v252_v17 = vand.u32 2147483648, %v237_v8 }
  0xf1   :  { %387 = vrsqrt.f32 %v236_v9  ;;  %v259_v18 = vand.u32 2147483648, %v238_v7  ;;  %vm242_vm6 = vcmp.eq.f32.partialorder %v236_v9, inf  ;;  %v245_v22 = vand.u32 2147483648, %v236_v9 }
  0xf2   :  { %vm244_vm7 = vcmp.eq.f32.partialorder %v236_v9, 0.0  ;;  %vm265_vm8 = vcmp.eq.f32.partialorder %v239_v4, 0.0 }
  0xf8   :  { %v382_v10 = vpop.eup %381 }
  0xf9   :  { %v384_v11 = vpop.eup %383  ;;  %v262_v12 = vmul.f32 %v382_v10, %v239_v4 }
  0xfa   :  { %v386_v13 = vpop.eup %385  ;;  %v255_v14 = vmul.f32 %v384_v11, %v238_v7 }
  0xfb   :  { %v388_v15 = vpop.eup %387  ;;  %v248_v16 = vmul.f32 %v386_v13, %v237_v8  ;;  %v264_v21 = vsel %vm263_vm1, %v239_v4, %v262_v12 }
  0xfc   :  { %v241_v19 = vmul.f32 %v388_v15, %v236_v9  ;;  %v257_v20 = vsel %vm256_vm3, %v238_v7, %v255_v14  ;;  %v267_v30 = vsel %vm265_vm8, %v266_v25, %v264_v21 }
  0xfd   :  { %v250_v23 = vsel %vm249_vm2, %v237_v8, %v248_v16  ;;  %v260_v24 = vsel %vm258_vm4, %v259_v18, %v257_v20  ;;  %v278_v35 = vmul.f32 %v323_v26, %v267_v30 }
  0xfe   :  { %v243_v27 = vsel %vm242_vm6, %v236_v9, %v241_v19  ;;  %v253_v28 = vsel %vm251_vm5, %v252_v17, %v250_v23  ;;  %v277_v33 = vmul.f32 %v323_v26, %v260_v24 }
  0xff   :  { %v246_v29 = vsel %vm244_vm7, %v245_v22, %v243_v27  ;;  %v276_v31 = vmul.f32 %v323_v26, %v253_v28  ;;  %v285_v40 = vsel %vm279_vm9, %v278_v35, 0.0 }
 0x100   :  { %v275_v32 = vmul.f32 %v323_v26, %v246_v29  ;;  %v283_v38 = vsel %vm279_vm9, %v277_v33, 0.0 }
 0x101   :  { %v281_v34 = vsel %vm279_vm9, %v276_v31, 0.0 }
 0x102   :  { %v280_v36 = vsel %vm279_vm9, %v275_v32, 0.0 }
 0x103   :  { %v282_v37 = vadd.f32 %v281_v34, %v280_v36 }
 0x105   :  { %v284_v39 = vadd.f32 %v283_v38, %v282_v37 }
 0x107   :  { %v286_v41 = vadd.f32 %v285_v40, %v284_v39 }
 0x109   :  { %287 = vadd.xlane.f32.xlu0 %v286_v41 }
 0x196   :  { %v288_v42 = vpop.xlane.xlu0 %287 }
 0x197   :  { %v289_v43 = vrot.slane %v288_v42, 4 }
 0x199   :  { %v290_v44 = vadd.f32 %v289_v43, %v288_v42 }
 0x19b   :  { %v291_v45 = vrot.slane %v290_v44, 2 }
 0x19d   :  { %v292_v46 = vadd.f32 %v291_v45, %v290_v44 }
 0x19f   :  { %v293_v47 = vrot.slane %v292_v46, 1 }
 0x1a1   :  { %v294_v48 = vadd.f32 %v293_v47, %v292_v46 }
 0x1a3   :  { %378 = vpush %v294_v48 }
 0x1d4   :  { %s379_s3 = spop %378 }
 0x1d5   :  { %297 = sst [smem:[#allocation2]] %s379_s3 }
 0x1d6   :  { %398 = shalt.err (!%p395_p2)
}
 0x1d7   :  { %s401_s24 = smov [#allocation2]  }
 0x1d8   :  { %305 = dma.smem_to_hbm %s401_s24, 16, %s542_s4, [#allocation3]  }
 0x1d9   :  { %399 = dma.done.wait [#allocation3], 16  }
 0x1da   :  { %400 = vsyncadd [#allocation3], 4294967280 }
 0x1db   :  { %309 = sfence }
 0x1dc   :  { %310 = vsyncpa [#allocation3], 1 }

</bundles_post_ra>
